<compile_context>
chip_gen: v7x
topology: tpu7x:2x2x1
jax: 0.10.0
libtpu: 0.0.40
codegen_flags: <defaults>
</compile_context>

<pallas_src>
import functools

import jax
import jax.numpy as jnp
from jax import lax
from jax.experimental import pallas as pl
from jax.experimental.pallas import tpu as pltpu


def _round_up(x, m):
    return (x + m - 1) // m * m


def _device_kind():
    try:
        return jax.devices()[0].device_kind.lower()
    except Exception:
        return ""


@functools.cache
def _supports_single_buffer():
    """Probe whether BlockSpec(pipeline_mode=pl.Buffered(1)) lowers on this backend."""
    try:
        def k(x_ref, o_ref):
            o_ref[...] = x_ref[...] + 1.0

        out = pl.pallas_call(
            k,
            out_shape=jax.ShapeDtypeStruct((8, 128), jnp.float32),
            grid=(2,),
            in_specs=[pl.BlockSpec((8, 128), lambda i: (0, 0),
                                   pipeline_mode=pl.Buffered(1))],
            out_specs=pl.BlockSpec((8, 128), lambda i: (0, 0)),
        )(jnp.zeros((8, 128), jnp.float32))
        jax.block_until_ready(out)
        return True
    except Exception:
        return False


@functools.cache
def _supports_bf16_exp():
    """Probe whether jnp.exp on bf16 vectors lowers on this backend."""
    try:
        def k(x_ref, o_ref):
            o_ref[...] = jnp.exp(x_ref[...].astype(jnp.bfloat16)).astype(jnp.float32)

        out = pl.pallas_call(
            k, out_shape=jax.ShapeDtypeStruct((8, 128), jnp.float32),
        )(jnp.zeros((8, 128), jnp.float32))
        jax.block_until_ready(out)
        return True
    except Exception:
        return False


def _const_block(shape):
    """Full-array block with a constant index map.

    It never changes across the 1-D grid, so double-buffering it only wastes
    VMEM; request single buffering when the backend accepts pl.Buffered(1).
    """
    index_map = lambda *_: (0,) * len(shape)
    if _supports_single_buffer():
        return pl.BlockSpec(shape, index_map, pipeline_mode=pl.Buffered(1))
    return pl.BlockSpec(shape, index_map)


def _mosaic_params(vmem_limit):
    kwargs = {"dimension_semantics": ("parallel",)}
    if vmem_limit:
        kwargs["vmem_limit_bytes"] = int(vmem_limit)
    return pltpu.CompilerParams(**kwargs)


# ---------------------------------------------------------------------------
# Kernel 1: packed multi-head projection + per-head L2 normalization.
#   hk[:, j*slab:(j+1)*slab] = l2norm(feat @ W_j + b_j)       (stored bf16)
# Heads are packed along the lane axis in 128-aligned slabs -> one lane-dense
# bf16 MXU pass and unmasked, aligned stores.
# ---------------------------------------------------------------------------
def _project_kernel(x_ref, w_ref, b_ref, hk_ref, *, n_heads, slab):
    # bf16 MXU operands, f32 accumulation; bias added post-MXU (promotes to f32).
    h = jnp.dot(x_ref[...], w_ref[...],
                preferred_element_type=jnp.float32) + b_ref[...]       # (tm, H*slab)
    for j in range(n_heads):
        lo = j * slab
        blk = h[:, lo:lo + slab]               # 128-aligned slab -> free view
        ss = jnp.sum(blk * blk, axis=-1, keepdims=True)
        # rsqrt runs on the EUP slot; zero-padded lanes contribute 0 to ss, so
        # the norm equals the norm over the real hid_dim columns.
        hk_ref[:, lo:lo + slab] = (blk * lax.rsqrt(jnp.maximum(ss, 1e-16))
                                   ).astype(hk_ref.dtype)


def _project_heads(xb, w_all, b_all, *, n_heads, slab, tm, vmem_limit):
    n_p, d_pad = xb.shape
    hh = n_heads * slab
    kernel = functools.partial(_project_kernel, n_heads=n_heads, slab=slab)
    return pl.pallas_call(
        kernel,
        out_shape=jax.ShapeDtypeStruct((n_p, hh), jnp.bfloat16),
        grid_spec=pltpu.PrefetchScalarGridSpec(
            num_scalar_prefetch=0,
            grid=(n_p // tm,),
            in_specs=[
                pl.BlockSpec((tm, d_pad), lambda i: (i, 0)),   # feature rows (bf16)
                _const_block((d_pad, hh)),                     # packed W (bf16)
                _const_block((1, hh)),                         # packed b (bf16)
            ],
            out_specs=pl.BlockSpec((tm, hh), lambda i: (i, 0)),
        ),
        compiler_params=_mosaic_params(vmem_limit),
        cost_estimate=pl.CostEstimate(
            flops=2 * n_p * d_pad * hh + 6 * n_p * hh,
            transcendentals=n_p * n_heads,
            bytes_accessed=(n_p * d_pad * 2 + d_pad * hh * 2 + hh * 2
                            + n_p * hh * 2)),
    )(xb, w_all, b_all)


# ---------------------------------------------------------------------------
# Kernel 2: masked cosine-softmax attention + propagation + residual mix.
# Grid is over query-row tiles ("parallel"); the head reduction is a short
# static loop so the adjacency mask, query-row load, and residual mix happen
# exactly once per tile.
# ---------------------------------------------------------------------------
def _attend_kernel(hk_ref, val_ref, ori_ref, adj_ref, out_ref, *,
                   n_heads, slab, tm, keep_ratio, temp, exp_bf16):
    # Head-invariant additive adjacency mask, built once per row tile from the
    # raw bf16 adjacency stream (adj == 0 -> -inf).
    bias = jnp.where(adj_ref[...] > 0, jnp.float32(0.0), jnp.float32(-1e30))

    # Query rows are sliced from the already-resident key block: no separate
    # hq DMA stream / VMEM buffer.  1/temp is folded into the small (tm, HH)
    # slab instead of the (tm, N) logits.
    row = pl.multiple_of(pl.program_id(0) * tm, tm)
    q_all = (hk_ref[pl.ds(row, tm), :].astype(jnp.float32)
             * jnp.float32(1.0 / temp)).astype(jnp.bfloat16)           # (tm, HH)

    val = val_ref[...]                                                 # (N, Dp) bf16
    acc = jnp.zeros(out_ref.shape, jnp.float32)                        # (tm, Dp)

    for j in range(n_heads):
        lo = j * slab
        q = q_all[:, lo:lo + slab]                                     # (tm, slab)
        k = hk_ref[:, lo:lo + slab]                                    # (N,  slab)
        # Contract the last dims of both operands: no explicit transpose.
        sim = lax.dot_general(q, k, (((1,), (1,)), ((), ())),
                              preferred_element_type=jnp.float32)      # (tm, N) f32
        logits = sim + bias
        m = jnp.max(logits, axis=-1, keepdims=True)
        z = logits - m
        if exp_bf16:
            # v6e/v7x only: bf16 EUP exp (2x packed), f32 row-sum accumulation.
            e = jnp.exp(z.astype(jnp.bfloat16))
            s = jnp.sum(e, axis=-1, keepdims=True, dtype=jnp.float32)
        else:
            e32 = jnp.exp(z)
            s = jnp.sum(e32, axis=-1, keepdims=True)
            e = e32.astype(jnp.bfloat16)
        # Deferred softmax normalization: scale the (tm, Dp) result, not (tm, N).
        prop = jnp.dot(e, val, preferred_element_type=jnp.float32)     # (tm, Dp)
        acc = acc + prop * pl.reciprocal(s, approx=True)

    # Head-invariant residual mix, applied exactly once per tile.
    out = (jnp.float32(keep_ratio) * ori_ref[...].astype(jnp.float32)
           + jnp.float32((1.0 - keep_ratio) / n_heads) * acc)
    out_ref[...] = out.astype(out_ref.dtype)


def _propagate(hk, xb, ori, adj, *, keep_ratio, temp, n_heads, slab, tm,
               exp_bf16, vmem_limit):
    n_p, d_pad = ori.shape
    hh = n_heads * slab
    kernel = functools.partial(
        _attend_kernel, n_heads=n_heads, slab=slab, tm=tm,
        keep_ratio=float(keep_ratio), temp=float(temp), exp_bf16=exp_bf16)
    return pl.pallas_call(
        kernel,
        out_shape=jax.ShapeDtypeStruct((n_p, d_pad), jnp.float32),
        grid_spec=pltpu.PrefetchScalarGridSpec(
            num_scalar_prefetch=0,
            grid=(n_p // tm,),
            in_specs=[
                _const_block((n_p, hh)),                      # keys (queries sliced)
                _const_block((n_p, d_pad)),                   # values (bf16 features)
                pl.BlockSpec((tm, d_pad), lambda i: (i, 0)),  # ori rows (residual)
                pl.BlockSpec((tm, n_p), lambda i: (i, 0)),    # raw adjacency rows
            ],
            out_specs=pl.BlockSpec((tm, d_pad), lambda i: (i, 0)),
        ),
        compiler_params=_mosaic_params(vmem_limit),
        cost_estimate=pl.CostEstimate(
            flops=n_heads * (2 * n_p * n_p * (slab + d_pad) + 6 * n_p * n_p)
                  + 4 * n_p * d_pad,
            transcendentals=n_heads * n_p * (n_p + 1),
            bytes_accessed=(n_p * hh * 2 + n_p * d_pad * 2 + n_p * d_pad * 4
                            + n_p * n_p * 2 + n_p * d_pad * 4)),
    )(hk, xb, ori, adj)


class MultiheadCosinePropagationNetSimSoftmaxRatio:
    """JAX/Pallas port of the PyTorch module (forward pass only)."""

    def __init__(self, input_dim, hid_dim, keep_ratio, n_hop, n_heads, temp, key):
        self.input_dim = int(input_dim)
        self.hid_dim = int(hid_dim)
        self.keep_ratio = float(keep_ratio)
        self.temp = float(temp)
        self.n_heads = int(n_heads)
        self.n_layers = int(n_hop) * 2
        # Lane-align everything: feature dim and per-head hidden slab -> 128.
        self.d_pad = _round_up(self.input_dim, 128)
        self.slab = _round_up(self.hid_dim, 128)

        # Per-generation tiling / VMEM limits (safe fallbacks on unknown chips).
        kind = _device_kind()
        is_v5e = ("v5e" in kind) or ("v5 lite" in kind) or ("v5lite" in kind)
        is_new = ("v6" in kind) or ("v7" in kind)
        self.tm_cap = 256 if is_new else 128            # 256-row MXU fill on v6e/v7x
        if "v7" in kind:
            self.vmem_limit = 40 * 1024 * 1024          # 64 MiB physical on v7x
        elif is_v5e or is_new:
            self.vmem_limit = 64 * 1024 * 1024          # 128 MiB physical
        else:
            self.vmem_limit = None                      # unknown: compiler default
        self.exp_bf16 = is_new and _supports_bf16_exp()

        self.params = []
        for _ in range(self.n_layers):
            key, kw, kb = jax.random.split(key, 3)
            w = jax.random.normal(kw, (self.n_heads, self.input_dim, self.hid_dim),
                                  jnp.float32) / jnp.sqrt(jnp.float32(self.input_dim))
            b = 0.01 * jax.random.normal(kb, (self.n_heads, 1, self.hid_dim),
                                         jnp.float32)
            # Pack heads into 128-lane-aligned slabs (zero pad) and store as bf16
            # MXU operands; padded rows/lanes are zero so they never contribute.
            w_p = jnp.pad(w, ((0, 0), (0, self.d_pad - self.input_dim),
                              (0, self.slab - self.hid_dim)))
            b_p = jnp.pad(b, ((0, 0), (0, 0), (0, self.slab - self.hid_dim)))
            w_all = jnp.transpose(w_p, (1, 0, 2)).reshape(
                self.d_pad, self.n_heads * self.slab).astype(jnp.bfloat16)
            b_all = b_p.reshape(1, self.n_heads * self.slab).astype(jnp.bfloat16)
            self.params.append((w_all, b_all))

    def __call__(self, features, adj_lst):
        n, d = features.shape
        tm = min(_round_up(n, 8), self.tm_cap)
        n_p = _round_up(n, tm)
        row_pad = n_p - n
        col_pad = self.d_pad - d

        feat_p = jnp.pad(features.astype(jnp.float32), ((0, row_pad), (0, col_pad)))
        ori_p = feat_p            # .clone() — JAX arrays are immutable.

        # Raw adjacency streamed as bf16; the -1e30 mask is built in-kernel.
        # Zero-padded rows/cols mask out the padded nodes automatically.
        adj_p_lst = [
            jnp.pad(adj.astype(jnp.bfloat16), ((0, row_pad), (0, row_pad)))
            for adj in adj_lst[:self.n_layers]
        ]

        x = feat_p
        for (w_all, b_all), adj_p in zip(self.params, adj_p_lst):
            xb = x.astype(jnp.bfloat16)     # shared bf16 operand for both kernels
            hk = _project_heads(xb, w_all, b_all, n_heads=self.n_heads,
                                slab=self.slab, tm=tm, vmem_limit=self.vmem_limit)
            x = _propagate(hk, xb, ori_p, adj_p, keep_ratio=self.keep_ratio,
                           temp=self.temp, n_heads=self.n_heads, slab=self.slab,
                           tm=tm, exp_bf16=self.exp_bf16,
                           vmem_limit=self.vmem_limit)
        return x[:n, :d].astype(features.dtype)


if __name__ == "__main__":
    key = jax.random.PRNGKey(0)

    # Small, module-consistent shapes.
    N = 8            # number of graph nodes
    input_dim = 32
    hid_dim = 32
    n_hop = 1        # -> n_hop * 2 = 2 propagation layers
    n_heads = 2
    keep_ratio = 0.5
    temp = 0.1

    key, k_feat, k_adj0, k_adj1, k_params = jax.random.split(key, 5)
    features = jax.random.normal(k_feat, (N, input_dim), jnp.float32)

    def make_adj(k):
        a = (jax.random.uniform(k, (N, N)) > 0.5).astype(jnp.float32)
        a = jnp.maximum(a, a.T)                                  # symmetric
        a = jnp.maximum(a, jnp.eye(N, dtype=jnp.float32))        # self-loops
        return a

    adj_lst = [make_adj(k_adj0), make_adj(k_adj1)]               # one adj per layer

    net = MultiheadCosinePropagationNetSimSoftmaxRatio(
        input_dim, hid_dim, keep_ratio, n_hop, n_heads, temp, k_params)

    out = jax.block_until_ready(net(features, adj_lst))
    assert out.shape == (N, input_dim) and bool(jnp.all(jnp.isfinite(out)))
    print("KERNEL_OK")
</pallas_src>

<mosaic_0001>
module attributes {stable_mosaic.version = 11 : i64} {
  func.func @k(%arg0: i32, %arg1: memref<8x128xf32, #tpu.memory_space<vmem>>, %arg2: memref<8x128xf32, #tpu.memory_space<vmem>>) attributes {dimension_semantics = [#tpu.dimension_semantics<arbitrary>], iteration_bounds = array<i64: 2>, scalar_prefetch = 0 : i64, scratch_operands = 0 : i64, tpu.core_type = #tpu.core_type<tc>, window_params = [{pipeline_mode = #tpu.pipeline_mode<synchronous>, transform_indices = @transform_0, window_bounds = array<i64: 8, 128>}, {pipeline_mode = #tpu.pipeline_mode<synchronous>, transform_indices = @transform_1, window_bounds = array<i64: 8, 128>}]} {
    %c0 = arith.constant 0 : index
    %c0_0 = arith.constant 0 : index
    %0 = vector.load %arg1[%c0, %c0_0] : memref<8x128xf32, #tpu.memory_space<vmem>>, vector<8x128xf32>
    %cst = arith.constant 1.000000e+00 : f32
    %1 = vector.broadcast %cst : f32 to vector<8x128xf32>
    %2 = arith.addf %0, %1 : vector<8x128xf32>
    %c0_1 = arith.constant 0 : index
    %c0_2 = arith.constant 0 : index
    %3 = vector.load %arg2[%c0_1, %c0_2] : memref<8x128xf32, #tpu.memory_space<vmem>>, vector<8x128xf32>
    tpu.vector_store %arg2[%c0_1, %c0_2], %2 {strides = array<i32>} : memref<8x128xf32, #tpu.memory_space<vmem>>, vector<8x128xf32>,
    return
  }
  func.func @transform_0(%arg0: i32) -> (i32, i32) {
    %c0_i32 = arith.constant 0 : i32
    %c0_i32_0 = arith.constant 0 : i32
    %c0_i32_1 = arith.constant 0 : i32
    return %c0_i32, %c0_i32_0 : i32, i32
  }
  func.func @transform_1(%arg0: i32) -> (i32, i32) {
    %c0_i32 = arith.constant 0 : i32
    %c0_i32_0 = arith.constant 0 : i32
    %c0_i32_1 = arith.constant 0 : i32
    return %c0_i32, %c0_i32_0 : i32, i32
  }
}

module attributes {stable_mosaic.version = 11 : i64} {
  func.func @_project_kernel(%arg0: i32, %arg1: memref<8x128xbf16, #tpu.memory_space<vmem>>, %arg2: memref<128x256xbf16, #tpu.memory_space<vmem>>, %arg3: memref<1x256xbf16, #tpu.memory_space<vmem>>, %arg4: memref<8x256xbf16, #tpu.memory_space<vmem>>) attributes {dimension_semantics = [#tpu.dimension_semantics<parallel>], iteration_bounds = array<i64: 1>, scalar_prefetch = 0 : i64, scratch_operands = 0 : i64, tpu.core_type = #tpu.core_type<tc>, window_params = [{transform_indices = @transform_0, window_bounds = array<i64: 8, 128>}, {pipeline_mode = #tpu.pipeline_mode<synchronous>, transform_indices = @transform_1, window_bounds = array<i64: 128, 256>}, {pipeline_mode = #tpu.pipeline_mode<synchronous>, transform_indices = @transform_2, window_bounds = array<i64: 1, 256>}, {transform_indices = @transform_3, window_bounds = array<i64: 8, 256>}]} {
    %c0 = arith.constant 0 : index
    %c0_0 = arith.constant 0 : index
    %0 = vector.load %arg1[%c0, %c0_0] : memref<8x128xbf16, #tpu.memory_space<vmem>>, vector<8x128xbf16>
    %c0_1 = arith.constant 0 : index
    %c0_2 = arith.constant 0 : index
    %1 = vector.load %arg2[%c0_1, %c0_2] : memref<128x256xbf16, #tpu.memory_space<vmem>>, vector<128x256xbf16>
    %cst = arith.constant dense<0.000000e+00> : vector<8x256xf32>
    %2 = tpu.matmul %0, %1, %cst {dimension_numbers = #tpu.dot_dimension_numbers<[1], [0], [0], [1], [0, 0, 1, 1], [], []>} : vector<8x128xbf16>, vector<128x256xbf16>, vector<8x256xf32> -> vector<8x256xf32>
    %c0_3 = arith.constant 0 : index
    %c0_4 = arith.constant 0 : index
    %3 = vector.load %arg3[%c0_3, %c0_4] : memref<1x256xbf16, #tpu.memory_space<vmem>>, vector<1x256xbf16>
    %4 = arith.extf %3 : vector<1x256xbf16> to vector<1x256xf32>
    %5 = vector.broadcast %4 : vector<1x256xf32> to vector<8x256xf32>
    %6 = arith.addf %2, %5 : vector<8x256xf32>
    %7 = vector.extract_strided_slice %6 {offsets = [0, 0], sizes = [8, 128], strides = [1, 1]} : vector<8x256xf32> to vector<8x128xf32>
    %8 = arith.mulf %7, %7 : vector<8x128xf32>
    %cst_5 = arith.constant dense<0.000000e+00> : vector<8xf32>
    %9 = vector.multi_reduction <add>, %8, %cst_5 [1] : vector<8x128xf32> to vector<8xf32>
    %10 = vector.shape_cast %9 : vector<8xf32> to vector<8x1xf32>
    %cst_6 = arith.constant 1.000000e-16 : f32
    %11 = vector.broadcast %cst_6 : f32 to vector<8x1xf32>
    %12 = arith.maximumf %10, %11 : vector<8x1xf32>
    %13 = math.rsqrt %12 : vector<8x1xf32>
    %14 = vector.broadcast %13 : vector<8x1xf32> to vector<8x128xf32>
    %15 = arith.mulf %7, %14 : vector<8x128xf32>
    %16 = arith.truncf %15 : vector<8x128xf32> to vector<8x128xbf16>
    %c0_7 = arith.constant 0 : index
    %c0_8 = arith.constant 0 : index
    %17 = vector.load %arg4[%c0_7, %c0_8] : memref<8x256xbf16, #tpu.memory_space<vmem>>, vector<8x128xbf16>
    tpu.vector_store %arg4[%c0_7, %c0_8], %16 {strides = array<i32>} : memref<8x256xbf16, #tpu.memory_space<vmem>>, vector<8x128xbf16>,
    %18 = vector.extract_strided_slice %6 {offsets = [0, 128], sizes = [8, 128], strides = [1, 1]} : vector<8x256xf32> to vector<8x128xf32>
    %19 = arith.mulf %18, %18 : vector<8x128xf32>
    %cst_9 = arith.constant dense<0.000000e+00> : vector<8xf32>
    %20 = vector.multi_reduction <add>, %19, %cst_9 [1] : vector<8x128xf32> to vector<8xf32>
    %21 = vector.shape_cast %20 : vector<8xf32> to vector<8x1xf32>
    %cst_10 = arith.constant 1.000000e-16 : f32
    %22 = vector.broadcast %cst_10 : f32 to vector<8x1xf32>
    %23 = arith.maximumf %21, %22 : vector<8x1xf32>
    %24 = math.rsqrt %23 : vector<8x1xf32>
    %25 = vector.broadcast %24 : vector<8x1xf32> to vector<8x128xf32>
    %26 = arith.mulf %18, %25 : vector<8x128xf32>
    %27 = arith.truncf %26 : vector<8x128xf32> to vector<8x128xbf16>
    %c0_11 = arith.constant 0 : index
    %c128 = arith.constant 128 : index
    %28 = vector.load %arg4[%c0_11, %c128] : memref<8x256xbf16, #tpu.memory_space<vmem>>, vector<8x128xbf16>
    tpu.vector_store %arg4[%c0_11, %c128], %27 {strides = array<i32>} : memref<8x256xbf16, #tpu.memory_space<vmem>>, vector<8x128xbf16>,
    return
  }
  func.func @transform_0(%arg0: i32) -> (i32, i32) {
    %c0_i32 = arith.constant 0 : i32
    %c0_i32_0 = arith.constant 0 : i32
    return %arg0, %c0_i32 : i32, i32
  }
  func.func @transform_1(%arg0: i32) -> (i32, i32) {
    %c0_i32 = arith.constant 0 : i32
    %c0_i32_0 = arith.constant 0 : i32
    %c0_i32_1 = arith.constant 0 : i32
    return %c0_i32, %c0_i32_0 : i32, i32
  }
  func.func @transform_2(%arg0: i32) -> (i32, i32) {
    %c0_i32 = arith.constant 0 : i32
    %c0_i32_0 = arith.constant 0 : i32
    %c0_i32_1 = arith.constant 0 : i32
    return %c0_i32, %c0_i32_0 : i32, i32
  }
  func.func @transform_3(%arg0: i32) -> (i32, i32) {
    %c0_i32 = arith.constant 0 : i32
    %c0_i32_0 = arith.constant 0 : i32
    return %arg0, %c0_i32 : i32, i32
  }
}

</mosaic_0001>

<bundles_post_ra>
// kernel: tpu_custom_call.1
= control target key start
LH: loop header
LB: loop body
LE: loop exit
PB: predicated region body
PF: predicated region fallthrough
CT: control target
= control target key end

     0   :  { %6 = vsyncpa [#allocation3], 0  ;;  %s341_s0 = inlined_call_operand.hbm [shape: f32[8,128], index: 0, kind: input, shape index: {}]   ;;  %s342_s1 = inlined_call_operand.hbm [shape: f32[8,128], index: 1, kind: output, shape index: {}]  }
   0x1   :  { %7 = vsyncpa [#allocation4], 0  ;;  %s262_s6 = smov 0  }
   0x2 LB: > { %s145_s7 = sadd.s32 4294967295, %s248_s6   ;;  %p146_p0 = scmp.ge.s32.totalorder %s248_s6, 1  ;;  %s248_s6 = sphi %s262_s6, %s13_s6  }
   0x3   : > { %p60_p1 = scmp.lt.s32.totalorder %s248_s6, 3  ;;  %p276_p3 = scmp.eq.s32.totalorder %s145_s7, 0 }
   0x4   : > { %s250_s10 = smov [#allocation2]   ;;  %s180_s15 = scalar_lea.hbm %s341_s0, 128 }
   0x5   : > { %p270_p2 = pnand %p146_p0, %p60_p1  ;;  %s73_s11 = sshll.u32 %s250_s10, 4  ;;  %s74_s11 = int_to_ptr.vmem [resolvable:$true] %s73_s11 }
   0x6   : > { %s347_s9 = scalar_select %p276_p3, 1, 0 }
   0x7   : > { %s346_s8 = scalar_select %p270_p2, 1, 0 }
   0x8   : > { %p162_p4 = pneg %p270_p2  ;;  %p181_p6 = scmp.ne.s32.totalorder %s341_s0, %s180_s15 }
   0x9   : > { %p187_p10 = scmp.lt.u32.totalorder %s180_s15, %s341_s0 }
   0xa   : > { %p284_p5 = pnand %p276_p3, %p162_p4 }
   0xc   : > { %p182_p7 = pneg %p284_p5 }
   0xe   : > { %p183_p8 = pnand %p182_p7, %p181_p6 }
  0x10   : > { %p184_p9 = pneg %p183_p8 }
  0x12   : > { %p189_p11 = pnand %p187_p10, %p184_p9 }
  0x14   : > { %192 = shalt.err (!%p189_p11)
}
  0x15   : > { %s193_s20 = scalar_lea.vmem %s74_s11, 128  ;;  %p201_p1 = scmp.lt.s32.totalorder %s74_s11, %s74_s11 }
  0x16   : > { %p194_p12 = scmp.ne.s32.totalorder %s74_s11, %s193_s20  ;;  %p202_p4 = scmp.lt.s32.totalorder %s193_s20, %s193_s20 }
  0x18   : > { %p196_p13 = pnand %p194_p12, %p182_p7  ;;  %p203_p3 = por %p202_p4, %p201_p1 }
  0x1a   : > { %p197_p0 = pneg %p196_p13 }
  0x1c   : > { %p204_p2 = pnand %p203_p3, %p197_p0 }
  0x1e   : > { %207 = shalt.err (!%p204_p2)
}
  0x1f   : > { %165 = dma.hbm_to_vmem [thread:$0]  (!%p284_p5), %s341_s0, 128, %s74_s11, [#allocation3]  }
  0x20   : > { %p349_p6 = scmp.ne.s32.totalorder %s346_s8, 0 }
  0x21   : > { %p350_p8 = scmp.ne.s32.totalorder (!%p349_p6), %s347_s9, 0 }
  0x22   : > { %86 = sbr.rel (%p349_p6) target bundleno = 67 (0x43), region = 24 }
  0x29   : > { %239 = dma.done.wait (%p350_p8), [#allocation3], 128  }
  0x2a   : > { %241 = vsyncadd (%p350_p8), [#allocation3], 4294967168  ;;  %s251_s23 = smov [#allocation5]   ;;  %v96_v0 = vld [vmem:[#allocation2] sm:$0xff]  ;;  %p312_p2 = scmp.eq.s32.totalorder %s145_s7, 1 }
  0x2b   : > { %s106_s24 = sshll.u32 %s251_s23, 4  ;;  %v97_v1 = vadd.f32 1.0, %v96_v0  ;;  %s107_s24 = int_to_ptr.vmem [resolvable:$true] %s106_s24 }
  0x2c   : > { %s208_s26 = scalar_lea.vmem %s107_s24, 128  ;;  %p215_p9 = scmp.lt.s32.totalorder %s107_s24, %s107_s24 }
  0x2d   : > { %98 = vst [vmem:[#allocation5] sm:$0xff] %v97_v1  ;;  %p209_p3 = scmp.ne.s32.totalorder %s107_s24, %s208_s26  ;;  %p216_p10 = scmp.lt.s32.totalorder %s208_s26, %s208_s26 }
  0x2f   : > { %p210_p5 = pnand %p209_p3, %p312_p2  ;;  %p217_p11 = por %p216_p10, %p215_p9 }
  0x31   : > { %p211_p7 = pneg %p210_p5 }
  0x33   : > { %p218_p12 = pnand %p217_p11, %p211_p7 }
  0x35   : > { %221 = shalt.err (!%p218_p12)
}
  0x36   : > { %s222_s29 = scalar_lea.hbm %s342_s1, 128 }
  0x37   : > { %p223_p13 = scmp.ne.s32.totalorder %s342_s1, %s222_s29  ;;  %p228_p4 = scmp.lt.u32.totalorder %s222_s29, %s342_s1 }
  0x39   : > { %p224_p0 = pnand %p223_p13, %p312_p2 }
  0x3b   : > { %p225_p1 = pneg %p224_p0 }
  0x3d   : > { %p230_p6 = pnand %p228_p4, %p225_p1 }
  0x3f   : > { %233 = shalt.err (!%p230_p6)
}
  0x40   : > { %159 = dma.vmem_to_hbm [thread:$0]  (%p312_p2), %s107_s24, 128, %s342_s1, [#allocation4]  }
  0x41   : > { %243 = dma.done.wait (%p312_p2), [#allocation4], 128  }
  0x42   : > { %245 = vsyncadd (%p312_p2), [#allocation4], 4294967168 }
  0x43 PF: > { %s13_s6 = sadd.s32 1, %s248_s6  }
  0x44   : > { %p10_p8 = scmp.ge.s32.totalorder %s13_s6, 4  }
  0x46   :  { %12 = sbr.rel (!%p10_p8) target bundleno = 2 (0x2), region = 53 }
  0x4d   :  { %119 = vsyncpa [#allocation3], 1 }
  0x4e   :  { %121 = vsyncpa [#allocation3 + $0x1], 1 }
  0x4f   :  { %122 = vsyncpa [#allocation4], 1 }
  0x50   :  { %124 = vsyncpa [#allocation4 + $0x1], 1 }

// kernel: tpu_custom_call.1
= control target key start
LH: loop header
LB: loop body
LE: loop exit
PB: predicated region body
PF: predicated region fallthrough
CT: control target
= control target key end

     0   :  { %8 = vsyncpa [#allocation3], 0  ;;  %s427_s0 = inlined_call_operand.hbm [shape: bf16[8,128], index: 0, kind: input, shape index: {}]   ;;  %s428_s1 = inlined_call_operand.hbm [shape: bf16[128,256], index: 1, kind: input, shape index: {}]   ;;  %s429_s2 = inlined_call_operand.vmem [shape: bf16[1,256], index: 2, kind: input, shape index: {}]   ;;  %s430_s3 = inlined_call_operand.hbm [shape: bf16[8,256], index: 3, kind: output, shape index: {}]  }
   0x1   :  { %9 = vsyncpa [#allocation6], 0 }
   0x2   :  { %10 = vsyncpa [#allocation4], 0  ;;  %s355_s12 = smov [#allocation2]   ;;  %s356_s14 = smov [#allocation5]  }
   0x3   :  { %s17_s13 = sshll.u32 %s355_s12, 4  ;;  %s26_s15 = sshll.u32 %s356_s14, 4  ;;  %s18_s13 = int_to_ptr.vmem [resolvable:$true] %s17_s13  ;;  %s381_s15 = int_to_ptr.vmem [resolvable:$true] %s26_s15 }
   0x4   :  { %s283_s18 = scalar_lea.hbm %s427_s0, 64 }
   0x5   :  { %p284_p0 = scmp.ne.s32.totalorder %s427_s0, %s283_s18  ;;  %p287_p1 = scmp.lt.u32.totalorder %s283_s18, %s427_s0 }
   0x7   :  { %p289_p2 = pnand %p287_p1, %p284_p0 }
   0x9   :  { %292 = shalt.err (!%p289_p2)
}
   0xa   :  { %s293_s23 = scalar_lea.vmem %s18_s13, 64  ;;  %p298_p4 = scmp.lt.s32.totalorder %s18_s13, %s18_s13 }
   0xb   :  { %p294_p3 = scmp.ne.s32.totalorder %s18_s13, %s293_s23  ;;  %p299_p5 = scmp.lt.s32.totalorder %s293_s23, %s293_s23 }
   0xd   :  { %p300_p6 = por %p299_p5, %p298_p4 }
   0xf   :  { %p301_p7 = pnand %p300_p6, %p294_p3 }
  0x11   :  { %304 = shalt.err (!%p301_p7)
}
  0x12   :  { %20 = dma.hbm_to_vmem [thread:$0]  %s427_s0, 64, %s18_s13, [#allocation3]  }
  0x13   :  { %s305_s28 = scalar_lea.hbm %s428_s1, 2048 }
  0x14   :  { %p306_p8 = scmp.ne.s32.totalorder %s428_s1, %s305_s28  ;;  %p309_p9 = scmp.lt.u32.totalorder %s305_s28, %s428_s1 }
  0x16   :  { %p311_p10 = pnand %p309_p9, %p306_p8 }
  0x18   :  { %314 = shalt.err (!%p311_p10)
}
  0x19   :  { %s315_s6 = scalar_lea.vmem %s381_s15, 2048  ;;  %p320_p12 = scmp.lt.s32.totalorder %s381_s15, %s381_s15 }
  0x1a   :  { %p316_p11 = scmp.ne.s32.totalorder %s381_s15, %s315_s6  ;;  %p321_p13 = scmp.lt.s32.totalorder %s315_s6, %s315_s6 }
  0x1c   :  { %p322_p0 = por %p321_p13, %p320_p12 }
  0x1e   :  { %p323_p1 = pnand %p322_p0, %p316_p11 }
  0x20   :  { %326 = shalt.err (!%p323_p1)
}
  0x21   :  { %s357_s0 = smov 128   ;;  %s358_s7 = smov 8  }
  0x22   :  { %32 = dma.hbm_to_vmem [thread:$0]  %s428_s1, 2048, %s381_s15, [#allocation6], %s357_s0, %s357_s0, %s358_s7  }
  0x23   :  { %349 = dma.done.wait [#allocation3], 64  }
  0x24   :  { %350 = vsyncadd [#allocation3], 4294967232 }
  0x25   :  { %351 = dma.done.wait [#allocation6], 2048  }
  0x26   :  { %352 = vsyncadd [#allocation6], 4294965248  ;;  %v359_v0 = vmov 0   ;;  %v255_v1 = vld [vmem:[#allocation5 + $0x4] ss:$8 sps:$4 sm:$0xff]   ;;  %v62_v18 = vlaneseq }
  0x27   :  { %192 = vmatprep.mubr.bf16.mxu0 %v359_v0  ;;  %v257_v2 = vld [vmem:[#allocation5] ss:$8 sps:$4 sm:$0xff]   ;;  %160 = vmatprep.subr.bf16.mxu0 %v255_v1  ;;  %v258_v3 = vld [vmem:[#allocation5 + $0x14] ss:$8 sps:$4 sm:$0xff]   ;;  %v260_v4 = vld [vmem:[#allocation5 + $0x10] ss:$8 sps:$4 sm:$0xff]  }
  0x28   :  { %161 = vmatpush1.bf16.msra.mxu0 %v257_v2  ;;  %v261_v5 = vld [vmem:[#allocation5 + $0x24] ss:$8 sps:$4 sm:$0xff]   ;;  %v263_v6 = vld [vmem:[#allocation5 + $0x20] ss:$8 sps:$4 sm:$0xff]   ;;  %v264_v7 = vld [vmem:[#allocation5 + $0x34] ss:$8 sps:$4 sm:$0xff]  }
  0x29   :  { %162 = vmatprep.subr.bf16.mxu0 %v258_v3  ;;  %v266_v8 = vld [vmem:[#allocation5 + $0x30] ss:$8 sps:$4 sm:$0xff]   ;;  %v267_v9 = vld [vmem:[#allocation5 + $0x44] ss:$8 sps:$4 sm:$0xff]   ;;  %v269_v10 = vld [vmem:[#allocation5 + $0x40] ss:$8 sps:$4 sm:$0xff]  }
  0x2a   :  { %v270_v11 = vld [vmem:[#allocation5 + $0x54] ss:$8 sps:$4 sm:$0xff]   ;;  %v272_v12 = vld [vmem:[#allocation5 + $0x50] ss:$8 sps:$4 sm:$0xff]   ;;  %v273_v13 = vld [vmem:[#allocation5 + $0x64] ss:$8 sps:$4 sm:$0xff]  }
  0x2b   :  { %v275_v14 = vld [vmem:[#allocation5 + $0x60] ss:$8 sps:$4 sm:$0xff]   ;;  %v276_v15 = vld [vmem:[#allocation5 + $0x74] ss:$8 sps:$4 sm:$0xff]   ;;  %v278_v16 = vld [vmem:[#allocation5 + $0x70] ss:$8 sps:$4 sm:$0xff]  }
  0x2c   :  { %163 = vmatpush1.bf16.msra.mxu0 %v260_v4  ;;  %v42_v17 = vld [vmem:[#allocation2] sm:$0xf]  ;;  %v63_v19 = vshrl.u32 %v62_v18, 7 }
  0x2d   :  { %164 = vmatprep.subr.bf16.mxu0 %v261_v5  ;;  %v59_v20 = vld [vmem:[%s429_s2] sm:$0x3]  ;;  %s360_s2 = smov [#allocation7]  }
  0x2e   :  { %v60_v21 = vunpack.c.l.bf16 %v59_v20  ;;  %v64_v22 = vsub.s32 0, %v63_v19  ;;  %v68_v23 = vsub.s32 2, %v63_v19  ;;  %s223_s11 = sshll.u32 %s360_s2, 4  ;;  %s224_s11 = int_to_ptr.vmem [resolvable:$true] %s223_s11 }
  0x2f   :  { %s327_s12 = scalar_lea.vmem %s224_s11, 128  ;;  %p332_p3 = scmp.lt.s32.totalorder %s224_s11, %s224_s11 }
  0x30   :  { %165 = vmatpush1.bf16.msra.mxu0 %v263_v6  ;;  %v65_v24 = vrot.slane %v60_v21, %v64_v22  ;;  %v69_v25 = vrot.slane %v60_v21, %v68_v23  ;;  %p328_p2 = scmp.ne.s32.totalorder %s224_s11, %s327_s12  ;;  %p333_p4 = scmp.lt.s32.totalorder %s327_s12, %s327_s12 }
  0x31   :  { %166 = vmatprep.subr.bf16.mxu0 %v264_v7 }
  0x32   :  { %v75_v26 = vrot.slane %v65_v24, %v64_v22  ;;  %v79_v27 = vrot.slane %v69_v25, %v64_v22  ;;  %p334_p5 = por %p333_p4, %p332_p3 }
  0x34   :  { %167 = vmatpush1.bf16.msra.mxu0 %v266_v8  ;;  %p335_p6 = pnand %p334_p5, %p328_p2 }
  0x35   :  { %168 = vmatprep.subr.bf16.mxu0 %v267_v9 }
  0x38   :  { %169 = vmatpush1.bf16.msra.mxu0 %v269_v10 }
  0x39   :  { %170 = vmatprep.subr.bf16.mxu0 %v270_v11 }
  0x3c   :  { %171 = vmatpush1.bf16.msra.mxu0 %v272_v12 }
  0x3d   :  { %172 = vmatprep.subr.bf16.mxu0 %v273_v13 }
  0x40   :  { %173 = vmatpush1.bf16.msra.mxu0 %v275_v14 }
  0x41   :  { %174 = vmatprep.subr.bf16.mxu0 %v276_v15 }
  0x44   :  { %175 = vmatpush1.bf16.msra.mxu0 %v278_v16 }
  0x47   :  { %193 = vmatmul.mubr.bf16.vlgmr.msra.gmra.mrb[0].mxu0 %v42_v17 }
 0x11a   :  { %v194_v28 = vpop.f32.mrb[0].mxu0 }
 0x11b   :  { %v195_v29 = vadd.f32 %v194_v28, %v75_v26  ;;  %v196_v30 = vpop.f32.mrb[1].mxu0 }
 0x11c   :  { %v198_v31 = vpop.f32.mrb[2].mxu0  ;;  %v197_v32 = vadd.f32 %v196_v30, %v79_v27 }
 0x11d   :  { %v199_v33 = vpop.f32.mrb[3].mxu0  ;;  %v201_v34 = vmul.f32 %v195_v29, %v195_v29 }
 0x11e   :  { %v209_v35 = vmul.f32 %v197_v32, %v197_v32 }
 0x11f   :  { %202 = vadd.xlane.f32.xlu0 %v201_v34 }
 0x123   :  { %210 = vadd.xlane.f32.xlu0 %v209_v35 }
 0x1ac   :  { %v203_v36 = vpop.xlane.xlu0 %202 }
 0x1ad   :  { %v204_v37 = vmax.f32 %v203_v36, 1e-16 }
 0x1af   :  { %279 = vrsqrt.f32 %v204_v37 }
 0x1b0   :  { %v211_v38 = vpop.xlane.xlu0 %210 }
 0x1b1   :  { %v212_v39 = vmax.f32 %v211_v38, 1e-16 }
 0x1b3   :  { %281 = vrsqrt.f32 %v212_v39 }
 0x1b9   :  { %v280_v40 = vpop.eup %279 }
 0x1ba   :  { %v206_v41 = vmul.f32 %v280_v40, %v195_v29 }
 0x1bc   :  { %v207_v42 = vpack.c.bf16 %v206_v41, %v206_v41 }
 0x1bd   :  { %v282_v43 = vpop.eup %281 }
 0x1be   :  { %208 = vst [vmem:[#allocation7] sm:$0xf] %v207_v42  ;;  %v214_v44 = vmul.f32 %v282_v43, %v197_v32 }
 0x1c0   :  { %v215_v45 = vpack.c.bf16 %v214_v44, %v214_v44 }
 0x1c2   :  { %216 = vst [vmem:[#allocation7 + $0x4] sm:$0xf] %v215_v45 }
 0x1c3   :  { %338 = shalt.err (!%p335_p6)
}
 0x1c4   :  { %s339_s15 = scalar_lea.hbm %s430_s3, 128 }
 0x1c5   :  { %p340_p7 = scmp.ne.s32.totalorder %s430_s3, %s339_s15  ;;  %p343_p8 = scmp.lt.u32.totalorder %s339_s15, %s430_s3 }
 0x1c7   :  { %p345_p9 = pnand %p343_p8, %p340_p7 }
 0x1c9   :  { %348 = shalt.err (!%p345_p9)
}
 0x1ca   :  { %226 = dma.vmem_to_hbm [thread:$0]  %s224_s11, 128, %s430_s3, [#allocation4]  }
 0x1cb   :  { %353 = dma.done.wait [#allocation4], 128  }
 0x1cc   :  { %354 = vsyncadd [#allocation4], 4294967168 }
 0x1cd   :  { %230 = vsyncpa [#allocation3], 1 }
 0x1ce   :  { %231 = vsyncpa [#allocation6], 1 }
 0x1cf   :  { %232 = vsyncpa [#allocation4], 1 }

</bundles_post_ra>
